<compile_context>
chip_gen: v7x
topology: tpu7x:2x2x1
jax: 0.10.0
libtpu: 0.0.40
codegen_flags: <defaults>
</compile_context>

<pallas_src>
from dataclasses import dataclass

import numpy as np
import jax
import jax.numpy as jnp
from jax.experimental import pallas as pl
from jax.experimental.pallas import tpu as pltpu

_EPS = 1e-5  # torch.nn.BatchNorm1d default


@dataclass
class LSTMConfig:
    input_hid_size: int
    lstm_hid_size: int
    lstm_num_layers: int
    bidir: bool = True


def _fold_bn(bias, gamma, beta, mean, var):
    """Fold Linear bias + BatchNorm1d (eval mode) into per-channel scale/shift."""
    scale = gamma / jnp.sqrt(var + _EPS)
    shift = (bias - mean) * scale + beta
    return scale.reshape(1, -1), shift.reshape(1, -1)


def _pack_lstm_layer(dir_params, Hh, ndirs, din):
    """Pack per-direction PyTorch-layout LSTM weights into the fused layout.

    dir_params: list over directions d of
        (w_ih [4*Hh, din], w_hh [4*Hh, Hh], bias [4*Hh])  -- torch row order i,f,g,o.
    Returns:
        w_pack [din + ndirs*Hh, 4*ndirs*Hh]  (w_ih^T on top, block-diagonal w_hh^T below)
        bias   [4*ndirs*Hh]
    Fused gate lane layout is gate-major / direction-inner:
        [ i_d0..i_d{nd-1} | f_... | g_... | o_... ], each sub-block Hh lanes,
    so the cell update is plain full-width elementwise math on [rows, ndirs*Hh].
    """
    Hs = ndirs * Hh
    w_ih_c = np.zeros((din, 4 * Hs), np.float32)
    w_hh_c = np.zeros((Hs, 4 * Hs), np.float32)
    b_c = np.zeros((4 * Hs,), np.float32)
    for d, (w_ih, w_hh, b) in enumerate(dir_params):
        w_ih = np.asarray(w_ih); w_hh = np.asarray(w_hh); b = np.asarray(b)
        for g in range(4):
            col = g * Hs + d * Hh
            w_ih_c[:, col:col + Hh] = w_ih[g * Hh:(g + 1) * Hh, :].T
            w_hh_c[d * Hh:(d + 1) * Hh, col:col + Hh] = w_hh[g * Hh:(g + 1) * Hh, :].T
            b_c[col:col + Hh] = b[g * Hh:(g + 1) * Hh]
    return np.concatenate([w_ih_c, w_hh_c], axis=0), b_c


# --------------------------- fused forward kernel ---------------------------

def _make_fused_kernel(*, B, RP, T, D, Hh, ndirs, num_layers, n_hidden):
    """Kernel ref order:
      seq_dup   [T*RP, D]            bf16  (time-major, [sentA rows | sentB rows | pad])
      cls       [B, D]               bf16
      rowmask   [T*RP, 1]            f32   (am*tt for A rows, am*(1-tt) for B rows)
      bias_fm   [num_layers+1, 4Hs]  f32   (per-layer gate bias; last row = fwd lane mask)
      per layer: w_pack [Din_l+Hs, 4Hs]  bf16
      per hidden MLP layer: w [din, dout] bf16, scale_shift [2, dout] f32
      w_out [dlast, n_out] bf16, b_out [1, n_out] f32
      o_ref [B, n_out] f32
    """
    Hs = ndirs * Hh

    def kernel(*refs):
        seq_ref, cls_ref, rowmask_ref, bias_ref = refs[0], refs[1], refs[2], refs[3]
        idx = 4
        lstm_w_refs = [refs[idx + l] for l in range(num_layers)]
        idx += num_layers
        mlp_refs = [(refs[idx + 2 * i], refs[idx + 2 * i + 1]) for i in range(n_hidden)]
        idx += 2 * n_hidden
        w_out_ref, b_out_ref, o_ref = refs[idx], refs[idx + 1], refs[idx + 2]

        bias_all = bias_ref[...]                                  # [L+1, 4Hs] f32
        fmask = bias_all[num_layers:num_layers + 1, :]            # [1, 4Hs] 1.0 on fwd lanes
        rowmask = rowmask_ref[...]                                # [T*RP, 1] f32

        def sigmoid(z):
            # Exact logistic via tanh: one EUP issue, no f32 divide on the critical path.
            return 0.5 * jnp.tanh(0.5 * z) + 0.5

        x_in = seq_ref[...]                                       # [T*RP, D] bf16
        layer_final = []                                          # final h per layer [RP, Hs]

        for l in range(num_layers):
            w_pack = lstm_w_refs[l][...]                          # bf16 [Din_l+Hs, 4Hs]
            din = D if l == 0 else Hs
            w_ih = w_pack[0:din, :]
            w_hh = w_pack[din:din + Hs, :]
            b_l = bias_all[l:l + 1, :]                            # [1, 4Hs]

            # ONE shared, unmasked input projection for all T steps and both directions
            # (N = 4*Hs lanes -> lane-dense 128 for the bidirectional Hh=16 config).
            xg = jnp.dot(x_in, w_ih, preferred_element_type=jnp.float32)   # [T*RP, 4Hs]
            if l == 0:
                # Sentence/attention masking is applied to the matmul RESULT (equivalent
                # to masking the input); the gate bias is added AFTER masking so a zeroed
                # token still feeds the bias, matching the reference semantics.
                xg = xg * rowmask
            if ndirs == 2:
                xg_f = xg * fmask + b_l           # forward-direction gate lanes (+ bias)
                xg_b = xg * (1.0 - fmask)         # backward-direction gate lanes
            else:
                xg_f = xg + b_l

            h = jnp.zeros((RP, Hs), jnp.float32)
            c = jnp.zeros((RP, Hs), jnp.float32)
            outs = [None] * T
            for s in range(T):                    # statically unrolled fused recurrence
                gin = xg_f[s * RP:(s + 1) * RP, :]
                if ndirs == 2:
                    # Backward direction consumes natural time T-1-s at step s.
                    gin = gin + xg_b[(T - 1 - s) * RP:(T - s) * RP, :]
                g_all = gin + jnp.dot(h.astype(jnp.bfloat16), w_hh,
                                      preferred_element_type=jnp.float32)   # [RP, 4Hs]
                sg = sigmoid(g_all)               # full-width: i | f | (unused) | o
                i_g = sg[:, 0:Hs]
                f_g = sg[:, Hs:2 * Hs]
                o_g = sg[:, 3 * Hs:4 * Hs]
                g_g = jnp.tanh(g_all[:, 2 * Hs:3 * Hs])
                c = f_g * c + i_g * g_g
                h = o_g * jnp.tanh(c)
                outs[s] = h
            layer_final.append(h)

            if l + 1 < num_layers:
                # Re-assemble the natural-time output sequence as the next layer's input.
                if ndirs == 2:
                    nat = [jnp.concatenate([outs[t][:, 0:Hh], outs[T - 1 - t][:, Hh:Hs]],
                                           axis=-1) for t in range(T)]
                else:
                    nat = outs
                x_in = jnp.concatenate(nat, axis=0).astype(jnp.bfloat16)

        hn = (layer_final[0] if num_layers == 1
              else jnp.concatenate(layer_final, axis=-1))          # [RP, L*Hs], (layer,dir) order
        emb_a = hn[0:B, :].astype(jnp.bfloat16)                    # sentence A final hidden
        emb_b = hn[B:2 * B, :].astype(jnp.bfloat16)                # sentence B final hidden
        cls = cls_ref[...]                                         # [B, D] bf16
        E = num_layers * Hs

        def head_dot(w):
            # Split matmul over [cls | embA | embB] -> no lane-concat of the feature vector.
            return (jnp.dot(cls,   w[0:D, :],          preferred_element_type=jnp.float32)
                    + jnp.dot(emb_a, w[D:D + E, :],     preferred_element_type=jnp.float32)
                    + jnp.dot(emb_b, w[D + E:D + 2 * E, :],
                              preferred_element_type=jnp.float32))

        feat = None
        for i, (w_ref, ss_ref) in enumerate(mlp_refs):
            w = w_ref[...]
            ss = ss_ref[...]                                       # [2, dout] = scale; shift
            y = head_dot(w) if i == 0 else jnp.dot(
                feat, w, preferred_element_type=jnp.float32)
            y = y * ss[0:1, :] + ss[1:2, :]                        # folded eval-mode BN
            feat = jnp.where(y > 0, y, 0.01 * y).astype(jnp.bfloat16)   # LeakyReLU(0.01)

        w_out = w_out_ref[...]
        b_out = b_out_ref[...]
        if n_hidden == 0:
            out = head_dot(w_out) + b_out
        else:
            out = jnp.dot(feat, w_out, preferred_element_type=jnp.float32) + b_out
        o_ref[...] = out

    return kernel


# -------------------------------- the module --------------------------------

class ConcatenatePoolerWithLSTMPallas:
    def __init__(self, lstm_config: LSTMConfig, output_perceptron_sizes,
                 count_last_layers_to_use: int = 4, *, key):
        self.count_last = count_last_layers_to_use
        self.Hh = lstm_config.lstm_hid_size
        self.num_layers = lstm_config.lstm_num_layers
        self.ndirs = 2 if lstm_config.bidir else 1
        self.Hs = self.ndirs * self.Hh
        self.D = lstm_config.input_hid_size

        sizes = list(output_perceptron_sizes)
        n_hidden = max(0, len(sizes) - 2)
        n_keys = 3 * self.num_layers * self.ndirs + 6 * n_hidden + 2
        keys = iter(jax.random.split(key, n_keys))

        def nrm(shape, std):
            return std * jax.random.normal(next(keys), shape, dtype=jnp.float32)

        # --- tokenwise (bi)LSTM: PyTorch-layout weights, packed into fused layout ---
        std = self.Hh ** -0.5
        self.lstm_w = []
        bias_rows = []
        for l in range(self.num_layers):
            din = self.D if l == 0 else self.Hs
            dir_params = []
            for _ in range(self.ndirs):
                w_ih = nrm((4 * self.Hh, din), std)       # torch weight_ih_l{l}[_reverse]
                w_hh = nrm((4 * self.Hh, self.Hh), std)   # torch weight_hh_l{l}[_reverse]
                b = nrm((4 * self.Hh,), std)              # b_ih + b_hh folded together
                dir_params.append((np.asarray(w_ih), np.asarray(w_hh), np.asarray(b)))
            w_pack, b_comb = _pack_lstm_layer(dir_params, self.Hh, self.ndirs, din)
            self.lstm_w.append(jnp.asarray(w_pack, dtype=jnp.bfloat16))
            bias_rows.append(b_comb)
        fmask = np.tile(np.concatenate([np.ones(self.Hh, np.float32),
                                        np.zeros(self.Hs - self.Hh, np.float32)]), 4)
        self.lstm_bias_fmask = jnp.asarray(np.stack(bias_rows + [fmask]),
                                           dtype=jnp.float32)      # [L+1, 4Hs]

        # --- classifier: (Linear + BN + LeakyReLU)* + final Linear (BN eval-folded) ---
        self.mlp_hidden = []
        for d_in, d_out in zip(sizes[:-2], sizes[1:-1]):
            w = nrm((d_in, d_out), d_in ** -0.5)
            bias = nrm((d_out,), 0.02)
            gamma = 1.0 + nrm((d_out,), 0.1)
            beta = nrm((d_out,), 0.1)
            mean = nrm((d_out,), 0.1)
            var = jnp.abs(nrm((d_out,), 0.1)) + 1.0
            scale, shift = _fold_bn(bias, gamma, beta, mean, var)
            ss = jnp.concatenate([scale, shift], axis=0)            # [2, d_out] f32
            self.mlp_hidden.append((w.astype(jnp.bfloat16), ss))
        self.w_out = nrm((sizes[-2], sizes[-1]), sizes[-2] ** -0.5).astype(jnp.bfloat16)
        self.b_out = nrm((sizes[-1],), 0.02).reshape(1, -1)

    def __call__(self, hidden_states, token_type_ids, attention_mask):
        """hidden_states: tuple/list of [B, S, H]; masks: [B, S] -> output [B, n_out]."""
        hs = [h.astype(jnp.float32) for h in list(hidden_states)[-self.count_last:]]
        # Single host-side concat of the last-L layers -> lane-dense [B, S, D] (one DMA).
        hs_cat = jnp.concatenate(hs, axis=-1)
        B, S, D = hs_cat.shape
        assert D == self.D, "lstm input_hid_size must equal count_last * H"
        T = S - 1
        RP = -(-2 * B // 8) * 8          # fused rows per step (2 sentences x B), padded to 8

        # Layout plumbing (host side, fused by XLA): cls token + time-major token slab,
        # duplicated per sentence and sublane-padded so every per-step slice is 8-aligned.
        cls = hs_cat[:, 0, :].astype(jnp.bfloat16)                       # [B, D]
        seq = jnp.transpose(hs_cat[:, 1:, :], (1, 0, 2))                 # [T, B, D]
        pad = jnp.zeros((T, RP - 2 * B, D), jnp.float32)
        seq_dup = jnp.concatenate([seq, seq, pad], axis=1)               # [T, RP, D]
        seq_dup = seq_dup.reshape(T * RP, D).astype(jnp.bfloat16)

        am = attention_mask.astype(jnp.float32)[:, 1:]                   # [B, T]
        tt = token_type_ids.astype(jnp.float32)[:, 1:]
        m_a = jnp.transpose(am * tt)                                     # [T, B] sentence A
        m_b = jnp.transpose(am * (1.0 - tt))                             # [T, B] sentence B
        m_pad = jnp.zeros((T, RP - 2 * B), jnp.float32)
        rowmask = jnp.concatenate([m_a, m_b, m_pad], axis=1).reshape(T * RP, 1)

        n_hidden = len(self.mlp_hidden)
        head_in = (self.mlp_hidden[0][0] if n_hidden else self.w_out).shape[0]
        assert head_in == D + 2 * self.num_layers * self.Hs, "perceptron input size mismatch"

        args = [seq_dup, cls, rowmask, self.lstm_bias_fmask] + list(self.lstm_w)
        for w, ss in self.mlp_hidden:
            args += [w, ss]
        args += [self.w_out, self.b_out]

        kernel = _make_fused_kernel(B=B, RP=RP, T=T, D=D, Hh=self.Hh, ndirs=self.ndirs,
                                    num_layers=self.num_layers, n_hidden=n_hidden)
        vmem = pl.BlockSpec(memory_space=pltpu.MemorySpace.VMEM)
        n_out = self.w_out.shape[1]
        # Single fused call, no grid: everything is KB-scale and VMEM-resident.  Do NOT
        # split over a batch grid / megacore at this size (latency-bound).  The explicit
        # VMEM limit keeps the fully-resident scheme honest against v7x's 64 MiB budget
        # if this design is ever reused at larger B / S / H.
        return pl.pallas_call(
            kernel,
            out_shape=jax.ShapeDtypeStruct((B, n_out), jnp.float32),
            in_specs=[vmem] * len(args),
            out_specs=vmem,
            compiler_params=pltpu.CompilerParams(vmem_limit_bytes=32 * 1024 * 1024),
        )(*args)


# ----------------------------------- main -----------------------------------

if __name__ == "__main__":
    key = jax.random.PRNGKey(0)
    k_params, k_hs, k_tt = jax.random.split(key, 3)

    B, S, H = 2, 8, 32
    n_backbone_layers = 5
    count_last = 4

    lstm_cfg = LSTMConfig(input_hid_size=count_last * H, lstm_hid_size=16,
                          lstm_num_layers=1, bidir=True)
    sent_emb = lstm_cfg.lstm_num_layers * (2 if lstm_cfg.bidir else 1) * lstm_cfg.lstm_hid_size
    feat_dim = count_last * H + 2 * sent_emb
    perceptron_sizes = [feat_dim, 64, 2]

    model = ConcatenatePoolerWithLSTMPallas(lstm_cfg, perceptron_sizes,
                                            count_last_layers_to_use=count_last,
                                            key=k_params)

    # Deterministic example inputs.
    hidden_states = tuple(
        jax.random.normal(k, (B, S, H), dtype=jnp.float32)
        for k in jax.random.split(k_hs, n_backbone_layers))
    token_type_ids = jax.random.bernoulli(k_tt, 0.5, (B, S)).astype(jnp.float32)
    attention_mask = jnp.concatenate(
        [jnp.ones((B, S - 2), jnp.float32),
         jnp.array([[1.0, 1.0], [0.0, 0.0]], jnp.float32)], axis=1)   # row 1 has padding

    out = model(hidden_states, token_type_ids, attention_mask)
    out = jax.block_until_ready(out)
    assert out.shape == (B, perceptron_sizes[-1]), out.shape
    assert bool(jnp.all(jnp.isfinite(out)))
    print("KERNEL_OK")
</pallas_src>

<mosaic_0001>
module attributes {stable_mosaic.version = 11 : i64} {
  func.func @kernel(%arg0: memref<56x128xbf16, #tpu.memory_space<vmem>>, %arg1: memref<2x128xbf16, #tpu.memory_space<vmem>>, %arg2: memref<56x1xf32, #tpu.memory_space<vmem>>, %arg3: memref<2x128xf32, #tpu.memory_space<vmem>>, %arg4: memref<160x128xbf16, #tpu.memory_space<vmem>>, %arg5: memref<192x64xbf16, #tpu.memory_space<vmem>>, %arg6: memref<2x64xf32, #tpu.memory_space<vmem>>, %arg7: memref<64x2xbf16, #tpu.memory_space<vmem>>, %arg8: memref<1x2xf32, #tpu.memory_space<vmem>>, %arg9: memref<2x2xf32, #tpu.memory_space<vmem>>) attributes {dimension_semantics = [], scalar_prefetch = 0 : i64, scratch_operands = 0 : i64, tpu.core_type = #tpu.core_type<tc>} {
    %c0 = arith.constant 0 : index
    %c0_0 = arith.constant 0 : index
    %0 = vector.load %arg3[%c0, %c0_0] : memref<2x128xf32, #tpu.memory_space<vmem>>, vector<2x128xf32>
    %1 = vector.extract_strided_slice %0 {offsets = [1, 0], sizes = [1, 128], strides = [1, 1]} : vector<2x128xf32> to vector<1x128xf32>
    %c0_1 = arith.constant 0 : index
    %c0_2 = arith.constant 0 : index
    %2 = vector.load %arg2[%c0_1, %c0_2] : memref<56x1xf32, #tpu.memory_space<vmem>>, vector<56x1xf32>
    %c0_3 = arith.constant 0 : index
    %c0_4 = arith.constant 0 : index
    %3 = vector.load %arg0[%c0_3, %c0_4] : memref<56x128xbf16, #tpu.memory_space<vmem>>, vector<56x128xbf16>
    %c0_5 = arith.constant 0 : index
    %c0_6 = arith.constant 0 : index
    %4 = vector.load %arg4[%c0_5, %c0_6] : memref<160x128xbf16, #tpu.memory_space<vmem>>, vector<160x128xbf16>
    %5 = vector.extract_strided_slice %4 {offsets = [0, 0], sizes = [128, 128], strides = [1, 1]} : vector<160x128xbf16> to vector<128x128xbf16>
    %6 = vector.extract_strided_slice %4 {offsets = [128, 0], sizes = [32, 128], strides = [1, 1]} : vector<160x128xbf16> to vector<32x128xbf16>
    %7 = vector.extract_strided_slice %0 {offsets = [0, 0], sizes = [1, 128], strides = [1, 1]} : vector<2x128xf32> to vector<1x128xf32>
    %cst = arith.constant dense<0.000000e+00> : vector<56x128xf32>
    %8 = tpu.matmul %3, %5, %cst {dimension_numbers = #tpu.dot_dimension_numbers<[1], [0], [0], [1], [0, 0, 1, 1], [], []>} : vector<56x128xbf16>, vector<128x128xbf16>, vector<56x128xf32> -> vector<56x128xf32>
    %9 = vector.broadcast %2 : vector<56x1xf32> to vector<56x128xf32>
    %10 = arith.mulf %8, %9 : vector<56x128xf32>
    %11 = vector.broadcast %1 : vector<1x128xf32> to vector<56x128xf32>
    %12 = arith.mulf %10, %11 : vector<56x128xf32>
    %13 = vector.broadcast %7 : vector<1x128xf32> to vector<56x128xf32>
    %14 = arith.addf %12, %13 : vector<56x128xf32>
    %cst_7 = arith.constant 1.000000e+00 : f32
    %15 = vector.broadcast %cst_7 : f32 to vector<1x128xf32>
    %16 = arith.subf %15, %1 : vector<1x128xf32>
    %17 = vector.broadcast %16 : vector<1x128xf32> to vector<56x128xf32>
    %18 = arith.mulf %10, %17 : vector<56x128xf32>
    %cst_8 = arith.constant 0.000000e+00 : f32
    %19 = vector.broadcast %cst_8 : f32 to vector<8x32xf32>
    %cst_9 = arith.constant 0.000000e+00 : f32
    %20 = vector.broadcast %cst_9 : f32 to vector<8x32xf32>
    %21 = vector.extract_strided_slice %14 {offsets = [0, 0], sizes = [8, 128], strides = [1, 1]} : vector<56x128xf32> to vector<8x128xf32>
    %22 = vector.extract_strided_slice %18 {offsets = [48, 0], sizes = [8, 128], strides = [1, 1]} : vector<56x128xf32> to vector<8x128xf32>
    %23 = arith.addf %21, %22 : vector<8x128xf32>
    %24 = arith.truncf %19 : vector<8x32xf32> to vector<8x32xbf16>
    %cst_10 = arith.constant dense<0.000000e+00> : vector<8x128xf32>
    %25 = tpu.matmul %24, %6, %cst_10 {dimension_numbers = #tpu.dot_dimension_numbers<[1], [0], [0], [1], [0, 0, 1, 1], [], []>} : vector<8x32xbf16>, vector<32x128xbf16>, vector<8x128xf32> -> vector<8x128xf32>
    %26 = arith.addf %23, %25 : vector<8x128xf32>
    %cst_11 = arith.constant 5.000000e-01 : f32
    %27 = vector.broadcast %cst_11 : f32 to vector<8x128xf32>
    %28 = arith.mulf %27, %26 : vector<8x128xf32>
    %29 = math.tanh %28 : vector<8x128xf32>
    %cst_12 = arith.constant 5.000000e-01 : f32
    %30 = vector.broadcast %cst_12 : f32 to vector<8x128xf32>
    %31 = arith.mulf %30, %29 : vector<8x128xf32>
    %cst_13 = arith.constant 5.000000e-01 : f32
    %32 = vector.broadcast %cst_13 : f32 to vector<8x128xf32>
    %33 = arith.addf %31, %32 : vector<8x128xf32>
    %34 = vector.extract_strided_slice %33 {offsets = [0, 0], sizes = [8, 32], strides = [1, 1]} : vector<8x128xf32> to vector<8x32xf32>
    %35 = vector.extract_strided_slice %33 {offsets = [0, 32], sizes = [8, 32], strides = [1, 1]} : vector<8x128xf32> to vector<8x32xf32>
    %36 = vector.extract_strided_slice %33 {offsets = [0, 96], sizes = [8, 32], strides = [1, 1]} : vector<8x128xf32> to vector<8x32xf32>
    %37 = vector.extract_strided_slice %26 {offsets = [0, 64], sizes = [8, 32], strides = [1, 1]} : vector<8x128xf32> to vector<8x32xf32>
    %38 = math.tanh %37 : vector<8x32xf32>
    %39 = arith.mulf %35, %20 : vector<8x32xf32>
    %40 = arith.mulf %34, %38 : vector<8x32xf32>
    %41 = arith.addf %39, %40 : vector<8x32xf32>
    %42 = math.tanh %41 : vector<8x32xf32>
    %43 = arith.mulf %36, %42 : vector<8x32xf32>
    %44 = vector.extract_strided_slice %14 {offsets = [8, 0], sizes = [8, 128], strides = [1, 1]} : vector<56x128xf32> to vector<8x128xf32>
    %45 = vector.extract_strided_slice %18 {offsets = [40, 0], sizes = [8, 128], strides = [1, 1]} : vector<56x128xf32> to vector<8x128xf32>
    %46 = arith.addf %44, %45 : vector<8x128xf32>
    %47 = arith.truncf %43 : vector<8x32xf32> to vector<8x32xbf16>
    %cst_14 = arith.constant dense<0.000000e+00> : vector<8x128xf32>
    %48 = tpu.matmul %47, %6, %cst_14 {dimension_numbers = #tpu.dot_dimension_numbers<[1], [0], [0], [1], [0, 0, 1, 1], [], []>} : vector<8x32xbf16>, vector<32x128xbf16>, vector<8x128xf32> -> vector<8x128xf32>
    %49 = arith.addf %46, %48 : vector<8x128xf32>
    %cst_15 = arith.constant 5.000000e-01 : f32
    %50 = vector.broadcast %cst_15 : f32 to vector<8x128xf32>
    %51 = arith.mulf %50, %49 : vector<8x128xf32>
    %52 = math.tanh %51 : vector<8x128xf32>
    %cst_16 = arith.constant 5.000000e-01 : f32
    %53 = vector.broadcast %cst_16 : f32 to vector<8x128xf32>
    %54 = arith.mulf %53, %52 : vector<8x128xf32>
    %cst_17 = arith.constant 5.000000e-01 : f32
    %55 = vector.broadcast %cst_17 : f32 to vector<8x128xf32>
    %56 = arith.addf %54, %55 : vector<8x128xf32>
    %57 = vector.extract_strided_slice %56 {offsets = [0, 0], sizes = [8, 32], strides = [1, 1]} : vector<8x128xf32> to vector<8x32xf32>
    %58 = vector.extract_strided_slice %56 {offsets = [0, 32], sizes = [8, 32], strides = [1, 1]} : vector<8x128xf32> to vector<8x32xf32>
    %59 = vector.extract_strided_slice %56 {offsets = [0, 96], sizes = [8, 32], strides = [1, 1]} : vector<8x128xf32> to vector<8x32xf32>
    %60 = vector.extract_strided_slice %49 {offsets = [0, 64], sizes = [8, 32], strides = [1, 1]} : vector<8x128xf32> to vector<8x32xf32>
    %61 = math.tanh %60 : vector<8x32xf32>
    %62 = arith.mulf %58, %41 : vector<8x32xf32>
    %63 = arith.mulf %57, %61 : vector<8x32xf32>
    %64 = arith.addf %62, %63 : vector<8x32xf32>
    %65 = math.tanh %64 : vector<8x32xf32>
    %66 = arith.mulf %59, %65 : vector<8x32xf32>
    %67 = vector.extract_strided_slice %14 {offsets = [16, 0], sizes = [8, 128], strides = [1, 1]} : vector<56x128xf32> to vector<8x128xf32>
    %68 = vector.extract_strided_slice %18 {offsets = [32, 0], sizes = [8, 128], strides = [1, 1]} : vector<56x128xf32> to vector<8x128xf32>
    %69 = arith.addf %67, %68 : vector<8x128xf32>
    %70 = arith.truncf %66 : vector<8x32xf32> to vector<8x32xbf16>
    %cst_18 = arith.constant dense<0.000000e+00> : vector<8x128xf32>
    %71 = tpu.matmul %70, %6, %cst_18 {dimension_numbers = #tpu.dot_dimension_numbers<[1], [0], [0], [1], [0, 0, 1, 1], [], []>} : vector<8x32xbf16>, vector<32x128xbf16>, vector<8x128xf32> -> vector<8x128xf32>
    %72 = arith.addf %69, %71 : vector<8x128xf32>
    %cst_19 = arith.constant 5.000000e-01 : f32
    %73 = vector.broadcast %cst_19 : f32 to vector<8x128xf32>
    %74 = arith.mulf %73, %72 : vector<8x128xf32>
    %75 = math.tanh %74 : vector<8x128xf32>
    %cst_20 = arith.constant 5.000000e-01 : f32
    %76 = vector.broadcast %cst_20 : f32 to vector<8x128xf32>
    %77 = arith.mulf %76, %75 : vector<8x128xf32>
    %cst_21 = arith.constant 5.000000e-01 : f32
    %78 = vector.broadcast %cst_21 : f32 to vector<8x128xf32>
    %79 = arith.addf %77, %78 : vector<8x128xf32>
    %80 = vector.extract_strided_slice %79 {offsets = [0, 0], sizes = [8, 32], strides = [1, 1]} : vector<8x128xf32> to vector<8x32xf32>
    %81 = vector.extract_strided_slice %79 {offsets = [0, 32], sizes = [8, 32], strides = [1, 1]} : vector<8x128xf32> to vector<8x32xf32>
    %82 = vector.extract_strided_slice %79 {offsets = [0, 96], sizes = [8, 32], strides = [1, 1]} : vector<8x128xf32> to vector<8x32xf32>
    %83 = vector.extract_strided_slice %72 {offsets = [0, 64], sizes = [8, 32], strides = [1, 1]} : vector<8x128xf32> to vector<8x32xf32>
    %84 = math.tanh %83 : vector<8x32xf32>
    %85 = arith.mulf %81, %64 : vector<8x32xf32>
    %86 = arith.mulf %80, %84 : vector<8x32xf32>
    %87 = arith.addf %85, %86 : vector<8x32xf32>
    %88 = math.tanh %87 : vector<8x32xf32>
    %89 = arith.mulf %82, %88 : vector<8x32xf32>
    %90 = vector.extract_strided_slice %14 {offsets = [24, 0], sizes = [8, 128], strides = [1, 1]} : vector<56x128xf32> to vector<8x128xf32>
    %91 = vector.extract_strided_slice %18 {offsets = [24, 0], sizes = [8, 128], strides = [1, 1]} : vector<56x128xf32> to vector<8x128xf32>
    %92 = arith.addf %90, %91 : vector<8x128xf32>
    %93 = arith.truncf %89 : vector<8x32xf32> to vector<8x32xbf16>
    %cst_22 = arith.constant dense<0.000000e+00> : vector<8x128xf32>
    %94 = tpu.matmul %93, %6, %cst_22 {dimension_numbers = #tpu.dot_dimension_numbers<[1], [0], [0], [1], [0, 0, 1, 1], [], []>} : vector<8x32xbf16>, vector<32x128xbf16>, vector<8x128xf32> -> vector<8x128xf32>
    %95 = arith.addf %92, %94 : vector<8x128xf32>
    %cst_23 = arith.constant 5.000000e-01 : f32
    %96 = vector.broadcast %cst_23 : f32 to vector<8x128xf32>
    %97 = arith.mulf %96, %95 : vector<8x128xf32>
    %98 = math.tanh %97 : vector<8x128xf32>
    %cst_24 = arith.constant 5.000000e-01 : f32
    %99 = vector.broadcast %cst_24 : f32 to vector<8x128xf32>
    %100 = arith.mulf %99, %98 : vector<8x128xf32>
    %cst_25 = arith.constant 5.000000e-01 : f32
    %101 = vector.broadcast %cst_25 : f32 to vector<8x128xf32>
    %102 = arith.addf %100, %101 : vector<8x128xf32>
    %103 = vector.extract_strided_slice %102 {offsets = [0, 0], sizes = [8, 32], strides = [1, 1]} : vector<8x128xf32> to vector<8x32xf32>
    %104 = vector.extract_strided_slice %102 {offsets = [0, 32], sizes = [8, 32], strides = [1, 1]} : vector<8x128xf32> to vector<8x32xf32>
    %105 = vector.extract_strided_slice %102 {offsets = [0, 96], sizes = [8, 32], strides = [1, 1]} : vector<8x128xf32> to vector<8x32xf32>
    %106 = vector.extract_strided_slice %95 {offsets = [0, 64], sizes = [8, 32], strides = [1, 1]} : vector<8x128xf32> to vector<8x32xf32>
    %107 = math.tanh %106 : vector<8x32xf32>
    %108 = arith.mulf %104, %87 : vector<8x32xf32>
    %109 = arith.mulf %103, %107 : vector<8x32xf32>
    %110 = arith.addf %108, %109 : vector<8x32xf32>
    %111 = math.tanh %110 : vector<8x32xf32>
    %112 = arith.mulf %105, %111 : vector<8x32xf32>
    %113 = vector.extract_strided_slice %14 {offsets = [32, 0], sizes = [8, 128], strides = [1, 1]} : vector<56x128xf32> to vector<8x128xf32>
    %114 = vector.extract_strided_slice %18 {offsets = [16, 0], sizes = [8, 128], strides = [1, 1]} : vector<56x128xf32> to vector<8x128xf32>
    %115 = arith.addf %113, %114 : vector<8x128xf32>
    %116 = arith.truncf %112 : vector<8x32xf32> to vector<8x32xbf16>
    %cst_26 = arith.constant dense<0.000000e+00> : vector<8x128xf32>
    %117 = tpu.matmul %116, %6, %cst_26 {dimension_numbers = #tpu.dot_dimension_numbers<[1], [0], [0], [1], [0, 0, 1, 1], [], []>} : vector<8x32xbf16>, vector<32x128xbf16>, vector<8x128xf32> -> vector<8x128xf32>
    %118 = arith.addf %115, %117 : vector<8x128xf32>
    %cst_27 = arith.constant 5.000000e-01 : f32
    %119 = vector.broadcast %cst_27 : f32 to vector<8x128xf32>
    %120 = arith.mulf %119, %118 : vector<8x128xf32>
    %121 = math.tanh %120 : vector<8x128xf32>
    %cst_28 = arith.constant 5.000000e-01 : f32
    %122 = vector.broadcast %cst_28 : f32 to vector<8x128xf32>
    %123 = arith.mulf %122, %121 : vector<8x128xf32>
    %cst_29 = arith.constant 5.000000e-01 : f32
    %124 = vector.broadcast %cst_29 : f32 to vector<8x128xf32>
    %125 = arith.addf %123, %124 : vector<8x128xf32>
    %126 = vector.extract_strided_slice %125 {offsets = [0, 0], sizes = [8, 32], strides = [1, 1]} : vector<8x128xf32> to vector<8x32xf32>
    %127 = vector.extract_strided_slice %125 {offsets = [0, 32], sizes = [8, 32], strides = [1, 1]} : vector<8x128xf32> to vector<8x32xf32>
    %128 = vector.extract_strided_slice %125 {offsets = [0, 96], sizes = [8, 32], strides = [1, 1]} : vector<8x128xf32> to vector<8x32xf32>
    %129 = vector.extract_strided_slice %118 {offsets = [0, 64], sizes = [8, 32], strides = [1, 1]} : vector<8x128xf32> to vector<8x32xf32>
    %130 = math.tanh %129 : vector<8x32xf32>
    %131 = arith.mulf %127, %110 : vector<8x32xf32>
    %132 = arith.mulf %126, %130 : vector<8x32xf32>
    %133 = arith.addf %131, %132 : vector<8x32xf32>
    %134 = math.tanh %133 : vector<8x32xf32>
    %135 = arith.mulf %128, %134 : vector<8x32xf32>
    %136 = vector.extract_strided_slice %14 {offsets = [40, 0], sizes = [8, 128], strides = [1, 1]} : vector<56x128xf32> to vector<8x128xf32>
    %137 = vector.extract_strided_slice %18 {offsets = [8, 0], sizes = [8, 128], strides = [1, 1]} : vector<56x128xf32> to vector<8x128xf32>
    %138 = arith.addf %136, %137 : vector<8x128xf32>
    %139 = arith.truncf %135 : vector<8x32xf32> to vector<8x32xbf16>
    %cst_30 = arith.constant dense<0.000000e+00> : vector<8x128xf32>
    %140 = tpu.matmul %139, %6, %cst_30 {dimension_numbers = #tpu.dot_dimension_numbers<[1], [0], [0], [1], [0, 0, 1, 1], [], []>} : vector<8x32xbf16>, vector<32x128xbf16>, vector<8x128xf32> -> vector<8x128xf32>
    %141 = arith.addf %138, %140 : vector<8x128xf32>
    %cst_31 = arith.constant 5.000000e-01 : f32
    %142 = vector.broadcast %cst_31 : f32 to vector<8x128xf32>
    %143 = arith.mulf %142, %141 : vector<8x128xf32>
    %144 = math.tanh %143 : vector<8x128xf32>
    %cst_32 = arith.constant 5.000000e-01 : f32
    %145 = vector.broadcast %cst_32 : f32 to vector<8x128xf32>
    %146 = arith.mulf %145, %144 : vector<8x128xf32>
    %cst_33 = arith.constant 5.000000e-01 : f32
    %147 = vector.broadcast %cst_33 : f32 to vector<8x128xf32>
    %148 = arith.addf %146, %147 : vector<8x128xf32>
    %149 = vector.extract_strided_slice %148 {offsets = [0, 0], sizes = [8, 32], strides = [1, 1]} : vector<8x128xf32> to vector<8x32xf32>
    %150 = vector.extract_strided_slice %148 {offsets = [0, 32], sizes = [8, 32], strides = [1, 1]} : vector<8x128xf32> to vector<8x32xf32>
    %151 = vector.extract_strided_slice %148 {offsets = [0, 96], sizes = [8, 32], strides = [1, 1]} : vector<8x128xf32> to vector<8x32xf32>
    %152 = vector.extract_strided_slice %141 {offsets = [0, 64], sizes = [8, 32], strides = [1, 1]} : vector<8x128xf32> to vector<8x32xf32>
    %153 = math.tanh %152 : vector<8x32xf32>
    %154 = arith.mulf %150, %133 : vector<8x32xf32>
    %155 = arith.mulf %149, %153 : vector<8x32xf32>
    %156 = arith.addf %154, %155 : vector<8x32xf32>
    %157 = math.tanh %156 : vector<8x32xf32>
    %158 = arith.mulf %151, %157 : vector<8x32xf32>
    %159 = vector.extract_strided_slice %14 {offsets = [48, 0], sizes = [8, 128], strides = [1, 1]} : vector<56x128xf32> to vector<8x128xf32>
    %160 = vector.extract_strided_slice %18 {offsets = [0, 0], sizes = [8, 128], strides = [1, 1]} : vector<56x128xf32> to vector<8x128xf32>
    %161 = arith.addf %159, %160 : vector<8x128xf32>
    %162 = arith.truncf %158 : vector<8x32xf32> to vector<8x32xbf16>
    %cst_34 = arith.constant dense<0.000000e+00> : vector<8x128xf32>
    %163 = tpu.matmul %162, %6, %cst_34 {dimension_numbers = #tpu.dot_dimension_numbers<[1], [0], [0], [1], [0, 0, 1, 1], [], []>} : vector<8x32xbf16>, vector<32x128xbf16>, vector<8x128xf32> -> vector<8x128xf32>
    %164 = arith.addf %161, %163 : vector<8x128xf32>
    %cst_35 = arith.constant 5.000000e-01 : f32
    %165 = vector.broadcast %cst_35 : f32 to vector<8x128xf32>
    %166 = arith.mulf %165, %164 : vector<8x128xf32>
    %167 = math.tanh %166 : vector<8x128xf32>
    %cst_36 = arith.constant 5.000000e-01 : f32
    %168 = vector.broadcast %cst_36 : f32 to vector<8x128xf32>
    %169 = arith.mulf %168, %167 : vector<8x128xf32>
    %cst_37 = arith.constant 5.000000e-01 : f32
    %170 = vector.broadcast %cst_37 : f32 to vector<8x128xf32>
    %171 = arith.addf %169, %170 : vector<8x128xf32>
    %172 = vector.extract_strided_slice %171 {offsets = [0, 0], sizes = [8, 32], strides = [1, 1]} : vector<8x128xf32> to vector<8x32xf32>
    %173 = vector.extract_strided_slice %171 {offsets = [0, 32], sizes = [8, 32], strides = [1, 1]} : vector<8x128xf32> to vector<8x32xf32>
    %174 = vector.extract_strided_slice %171 {offsets = [0, 96], sizes = [8, 32], strides = [1, 1]} : vector<8x128xf32> to vector<8x32xf32>
    %175 = vector.extract_strided_slice %164 {offsets = [0, 64], sizes = [8, 32], strides = [1, 1]} : vector<8x128xf32> to vector<8x32xf32>
    %176 = math.tanh %175 : vector<8x32xf32>
    %177 = arith.mulf %173, %156 : vector<8x32xf32>
    %178 = arith.mulf %172, %176 : vector<8x32xf32>
    %179 = arith.addf %177, %178 : vector<8x32xf32>
    %180 = math.tanh %179 : vector<8x32xf32>
    %181 = arith.mulf %174, %180 : vector<8x32xf32>
    %182 = vector.extract_strided_slice %181 {offsets = [0, 0], sizes = [2, 32], strides = [1, 1]} : vector<8x32xf32> to vector<2x32xf32>
    %183 = arith.truncf %182 : vector<2x32xf32> to vector<2x32xbf16>
    %184 = vector.extract_strided_slice %181 {offsets = [2, 0], sizes = [2, 32], strides = [1, 1]} : vector<8x32xf32> to vector<2x32xf32>
    %185 = arith.truncf %184 : vector<2x32xf32> to vector<2x32xbf16>
    %c0_38 = arith.constant 0 : index
    %c0_39 = arith.constant 0 : index
    %186 = vector.load %arg1[%c0_38, %c0_39] : memref<2x128xbf16, #tpu.memory_space<vmem>>, vector<2x128xbf16>
    %c0_40 = arith.constant 0 : index
    %c0_41 = arith.constant 0 : index
    %187 = vector.load %arg5[%c0_40, %c0_41] : memref<192x64xbf16, #tpu.memory_space<vmem>>, vector<192x64xbf16>
    %c0_42 = arith.constant 0 : index
    %c0_43 = arith.constant 0 : index
    %188 = vector.load %arg6[%c0_42, %c0_43] : memref<2x64xf32, #tpu.memory_space<vmem>>, vector<2x64xf32>
    %189 = vector.extract_strided_slice %187 {offsets = [0, 0], sizes = [128, 64], strides = [1, 1]} : vector<192x64xbf16> to vector<128x64xbf16>
    %cst_44 = arith.constant dense<0.000000e+00> : vector<2x64xf32>
    %190 = tpu.matmul %186, %189, %cst_44 {dimension_numbers = #tpu.dot_dimension_numbers<[1], [0], [0], [1], [0, 0, 1, 1], [], []>} : vector<2x128xbf16>, vector<128x64xbf16>, vector<2x64xf32> -> vector<2x64xf32>
    %191 = vector.extract_strided_slice %187 {offsets = [128, 0], sizes = [32, 64], strides = [1, 1]} : vector<192x64xbf16> to vector<32x64xbf16>
    %cst_45 = arith.constant dense<0.000000e+00> : vector<2x64xf32>
    %192 = tpu.matmul %183, %191, %cst_45 {dimension_numbers = #tpu.dot_dimension_numbers<[1], [0], [0], [1], [0, 0, 1, 1], [], []>} : vector<2x32xbf16>, vector<32x64xbf16>, vector<2x64xf32> -> vector<2x64xf32>
    %193 = arith.addf %190, %192 : vector<2x64xf32>
    %194 = vector.extract_strided_slice %187 {offsets = [160, 0], sizes = [32, 64], strides = [1, 1]} : vector<192x64xbf16> to vector<32x64xbf16>
    %cst_46 = arith.constant dense<0.000000e+00> : vector<2x64xf32>
    %195 = tpu.matmul %185, %194, %cst_46 {dimension_numbers = #tpu.dot_dimension_numbers<[1], [0], [0], [1], [0, 0, 1, 1], [], []>} : vector<2x32xbf16>, vector<32x64xbf16>, vector<2x64xf32> -> vector<2x64xf32>
    %196 = arith.addf %193, %195 : vector<2x64xf32>
    %197 = vector.extract_strided_slice %188 {offsets = [0, 0], sizes = [1, 64], strides = [1, 1]} : vector<2x64xf32> to vector<1x64xf32>
    %198 = vector.broadcast %197 : vector<1x64xf32> to vector<2x64xf32>
    %199 = arith.mulf %196, %198 : vector<2x64xf32>
    %200 = vector.extract_strided_slice %188 {offsets = [1, 0], sizes = [1, 64], strides = [1, 1]} : vector<2x64xf32> to vector<1x64xf32>
    %201 = vector.broadcast %200 : vector<1x64xf32> to vector<2x64xf32>
    %202 = arith.addf %199, %201 : vector<2x64xf32>
    %cst_47 = arith.constant 0.000000e+00 : f32
    %203 = vector.broadcast %cst_47 : f32 to vector<2x64xf32>
    %204 = arith.cmpf ogt, %202, %203 : vector<2x64xf32>
    %cst_48 = arith.constant 0.00999999977 : f32
    %205 = vector.broadcast %cst_48 : f32 to vector<2x64xf32>
    %206 = arith.mulf %205, %202 : vector<2x64xf32>
    %207 = arith.select %204, %202, %206 : vector<2x64xi1>, vector<2x64xf32>
    %208 = arith.truncf %207 : vector<2x64xf32> to vector<2x64xbf16>
    %c0_49 = arith.constant 0 : index
    %c0_50 = arith.constant 0 : index
    %209 = vector.load %arg7[%c0_49, %c0_50] : memref<64x2xbf16, #tpu.memory_space<vmem>>, vector<64x2xbf16>
    %c0_51 = arith.constant 0 : index
    %c0_52 = arith.constant 0 : index
    %210 = vector.load %arg8[%c0_51, %c0_52] : memref<1x2xf32, #tpu.memory_space<vmem>>, vector<1x2xf32>
    %cst_53 = arith.constant dense<0.000000e+00> : vector<2x2xf32>
    %211 = tpu.matmul %208, %209, %cst_53 {dimension_numbers = #tpu.dot_dimension_numbers<[1], [0], [0], [1], [0, 0, 1, 1], [], []>} : vector<2x64xbf16>, vector<64x2xbf16>, vector<2x2xf32> -> vector<2x2xf32>
    %212 = vector.broadcast %210 : vector<1x2xf32> to vector<2x2xf32>
    %213 = arith.addf %211, %212 : vector<2x2xf32>
    %c0_54 = arith.constant 0 : index
    %c0_55 = arith.constant 0 : index
    %214 = vector.load %arg9[%c0_54, %c0_55] : memref<2x2xf32, #tpu.memory_space<vmem>>, vector<2x2xf32>
    tpu.vector_store %arg9[%c0_54, %c0_55], %213 {strides = array<i32>} : memref<2x2xf32, #tpu.memory_space<vmem>>, vector<2x2xf32>,
    return
  }
}

</mosaic_0001>

<bundles_post_ra>
// kernel: tpu_custom_call.1
= control target key start
LH: loop header
LB: loop body
LE: loop exit
PB: predicated region body
PF: predicated region fallthrough
CT: control target
= control target key end

     0   :  { %v1460_v2 = vmov 0.0   ;;  %vm1461_vm0 = vmmov 0   ;;  %v1462_v3 = vmov 0   ;;  %s1816_s0 = inlined_call_operand.vmem [shape: bf16[56,128], index: 0, kind: input, shape index: {}]   ;;  %s1817_s1 = inlined_call_operand.vmem [shape: bf16[2,128], index: 1, kind: input, shape index: {}]   ;;  %s1818_s2 = inlined_call_operand.vmem [shape: f32[56,1], index: 2, kind: input, shape index: {}]   ;;  %s1819_s3 = inlined_call_operand.vmem [shape: f32[2,128], index: 3, kind: input, shape index: {}]   ;;  %s1820_s4 = inlined_call_operand.vmem [shape: bf16[160,128], index: 4, kind: input, shape index: {}]   ;;  %s1821_s5 = inlined_call_operand.vmem [shape: bf16[192,64], index: 5, kind: input, shape index: {}]   ;;  %s1822_s6 = inlined_call_operand.vmem [shape: f32[2,64], index: 6, kind: input, shape index: {}]   ;;  %s1823_s7 = inlined_call_operand.vmem [shape: bf16[64,2], index: 7, kind: input, shape index: {}]   ;;  %s1824_s8 = inlined_call_operand.vmem [shape: f32[1,2], index: 8, kind: input, shape index: {}]   ;;  %s1825_s9 = inlined_call_operand.hbm [shape: f32[2,2], index: 9, kind: output, shape index: {}]  }
   0x1   :  { %v1364_v0 = vld [vmem:[%s1820_s4] sm:$0xff]   ;;  %v1365_v1 = vld [vmem:[%s1820_s4 + $0x8] sm:$0xff]   ;;  %1247 = vmatprep.subr.bf16.mxu1 %v1460_v2  ;;  %1251 = vmatprep.mubr.msk.bf16.mxu1 %vm1461_vm0, %v1460_v2  ;;  %v1366_v4 = vld [vmem:[%s1820_s4 + $0x10] sm:$0xff]  }
   0x2   :  { %1223 = vmatprep.subr.bf16.mxu0 %v1364_v0  ;;  %1362 = vset.pattern.permute.xlu0 %v1462_v3  ;;  %v1367_v5 = vld [vmem:[%s1820_s4 + $0x18] sm:$0xff]   ;;  %v1372_v6 = vld [vmem:[%s1816_s0] sm:$0xff]   ;;  %v1547_v9 = vld [vmem:[%s1820_s4 + $0x48] sm:$0xff]  }
   0x3   :  { %1224 = vmatpush3.bf16.msra.mxu0 %v1364_v0  ;;  %1363 = vset.pattern.permute.xlu1 %v1462_v3  ;;  %v1537_v7 = vld [vmem:[%s1820_s4 + $0x40] sm:$0xff]   ;;  %v1369_v11 = vld [vmem:[%s1820_s4 + $0x28] sm:$0xff]   ;;  %v41_v12 = vld [vmem:[%s1818_s2 + $0x30] sm:$0xff] }
   0x4   :  { %1225 = vmatprep.subr.bf16.mxu0 %v1365_v1  ;;  %1239 = vmatprep.mubr.bf16.mxu0 %v1372_v6  ;;  %v1368_v8 = vld [vmem:[%s1820_s4 + $0x20] sm:$0xff]   ;;  %v1370_v13 = vld [vmem:[%s1820_s4 + $0x30] sm:$0xff]   ;;  %v1371_v14 = vld [vmem:[%s1820_s4 + $0x38] sm:$0xff]  }
   0x5   :  { %1248 = vmatpush3.bf16.msra.mxu1 %v1537_v7  ;;  %v35_v10 = vld [vmem:[%s1818_s2] sm:$0xff] }
   0x6   :  { %1249 = vmatprep.subr.bf16.mxu1 %v1460_v2  ;;  %205 = vperm.xlu0 %1362, %v35_v10  }
   0x7   :  { %1226 = vmatpush3.bf16.msra.mxu0 %v1365_v1 }
   0x8   :  { %1227 = vmatprep.subr.bf16.mxu0 %v1366_v4 }
   0x9   :  { %1250 = vmatpush3.bf16.msra.mxu1 %v1547_v9 }
   0xa   :  { %1255 = vmatprep.subr.bf16.mxu1 %v1460_v2  ;;  %235 = vperm.xlu0 %1362, %v41_v12  }
   0xb   :  { %1228 = vmatpush3.bf16.msra.mxu0 %v1366_v4 }
   0xc   :  { %1229 = vmatprep.subr.bf16.mxu0 %v1367_v5  ;;  %1252 = vmatmul.mubr.bf16.vlgmr.msra.gmra.mrb[0].mxu1 %v1462_v3 }
   0xd   :  { %1256 = vmatpush3.bf16.msra.mxu1 %v1537_v7  ;;  %1259 = vmatprep.mubr.msk.bf16.mxu1 %vm1461_vm0, %v1460_v2 }
   0xe   :  { %1257 = vmatprep.subr.bf16.mxu1 %v1460_v2 }
   0xf   :  { %1230 = vmatpush3.bf16.msra.mxu0 %v1367_v5 }
  0x10   :  { %1231 = vmatprep.subr.bf16.mxu0 %v1368_v8 }
  0x11   :  { %1258 = vmatpush3.bf16.msra.mxu1 %v1547_v9 }
  0x12   :  { %1263 = vmatprep.subr.bf16.mxu1 %v1460_v2 }
  0x13   :  { %1232 = vmatpush3.bf16.msra.mxu0 %v1368_v8 }
  0x14   :  { %1233 = vmatprep.subr.bf16.mxu0 %v1369_v11 }
  0x17   :  { %1234 = vmatpush3.bf16.msra.mxu0 %v1369_v11 }
  0x18   :  { %1235 = vmatprep.subr.bf16.mxu0 %v1370_v13 }
  0x19   :  { %14 = vsyncpa [#allocation3], 0  ;;  %v1373_v15 = vld [vmem:[%s1816_s0 + $0x8] sm:$0xff]   ;;  %v1375_v16 = vld [vmem:[%s1816_s0 + $0x10] sm:$0xff]   ;;  %v245_v22 = vlaneseq  ;;  %s1464_s20 = smov 32   ;;  %vm292_vm1 = vcmask 261120  }
  0x1a   :  { %v1376_v17 = vld [vmem:[%s1816_s0 + $0x18] ss:$0 sps:$4 sm:$0xff]   ;;  %v34_v28 = vld [vmem:[%s1819_s3] sm:$0x3]  ;;  %s1463_s3 = smov 64   ;;  %v36_v63 = vld [vmem:[%s1818_s2 + $0x8] sm:$0xff] }
  0x1b   :  { %1236 = vmatpush3.bf16.msra.mxu0 %v1370_v13  ;;  %v1584_v23 = vshrl.u32 %v245_v22, 7  ;;  %v267_v34 = vsub.f32 1.0, %v34_v28  ;;  %v40_v4 = vld [vmem:[%s1818_s2 + $0x28] sm:$0xff]  ;;  %vm1070_vm3 = vcmask 523264   ;;  %s1465_s4 = smov [#allocation2]   ;;  %vm1114_vm4 = vcmask 9216  }
  0x1c   :  { %1237 = vmatprep.subr.bf16.mxu0 %v1371_v14  ;;  %s1122_s18 = sshll.u32 %s1465_s4, 4  ;;  %s1123_s18 = int_to_ptr.vmem [resolvable:$true] %s1122_s18 }
  0x1d   :  { %v1587_v24 = vsub.s32 1, %v1584_v23  ;;  %v258_v33 = vsub.s32 0, %v1584_v23  ;;  %v1164_v23 = vld [vmem:[%s1824_s8] ss:$0 sm:$0xff]  ;;  %s1436_s19 = scalar_lea.vmem %s1123_s18, 32  ;;  %p1441_p1 = scmp.lt.s32.totalorder %s1123_s18, %s1123_s18 }
  0x1e   :  { %p1437_p0 = scmp.ne.s32.totalorder %s1123_s18, %s1436_s19  ;;  %p1442_p2 = scmp.lt.s32.totalorder %s1436_s19, %s1436_s19 }
  0x1f   :  { %1238 = vmatpush3.bf16.msra.mxu0 %v1371_v14  ;;  %v1597_v31 = vrot.slane %v34_v28, %v1587_v24  ;;  %v1603_v36 = vrot.slane %v34_v28, %v258_v33  ;;  %v1606_v39 = vrot.slane %v267_v34, %v1587_v24 }
  0x20   :  { %1311 = vmatprep.subr.bf16.mxu0 %v1460_v2  ;;  %p1443_p3 = por %p1442_p2, %p1441_p1 }
  0x22   :  { %1240 = vmatmul.mubr.bf16.vlgmr.msra.gmra.mrb[0].mxu0 %v1373_v15  ;;  %p1444_p4 = pnand %p1443_p3, %p1437_p0 }
  0x23   :  { %1243 = vmatprep.mubr.bf16.mxu0 %v1375_v16 }
  0x2a   :  { %1244 = vmatmul.mubr.bf16.gmra.mrb[4].mxu0 %v1376_v17 }
  0x2b   :  { %1327 = vmatprep.mubr.msk.bf16.mxu0 %vm1461_vm0, %v1460_v2 }
  0x85   :  { %v206_v26 = vpop.permute.xlu0 %205 }
  0x89   :  { %v236_v37 = vpop.permute.xlu0 %235 }
  0xdf   :  { %v330_v18 = vpop.f32.mrb[0].mxu1 }
  0xe0   :  { %v1253_v19 = vpop.f32.mrb[1].mxu1 }
  0xe1   :  { %v333_v20 = vpop.f32.mrb[2].mxu1 }
  0xe2   :  { %v1254_v21 = vpop.f32.mrb[3].mxu1 }
  0xf5   :  { %v1589_v25 = vpop.f32.mrb[0].mxu0 }
  0xf6   :  { %v173_v27 = vpop.f32.mrb[1].mxu0 }
  0xf7   :  { %v1594_v29 = vpop.f32.mrb[2].mxu0  ;;  %v238_v30 = vmul.f32 %v206_v26, %v173_v27 }
  0xf8   :  { %v176_v32 = vpop.f32.mrb[3].mxu0 }
  0xf9   :  { %v249_v35 = vmul.f32 %v1597_v31, %v238_v30  ;;  %v272_v47 = vmul.f32 %v1606_v39, %v238_v30 }
  0xfb   :  { %v260_v46 = vadd.f32 %v1603_v36, %v249_v35 }
  0xfd   :  { %v1245_v38 = vpop.f32.mrb[4].mxu0 }
  0xfe   :  { %v244_v40 = vmul.f32 %v1245_v38, %v236_v37  ;;  %v1608_v41 = vpop.f32.mrb[5].mxu0 }
  0xff   :  { %v1246_v42 = vpop.f32.mrb[6].mxu0 }
 0x100   :  { %v255_v43 = vmul.f32 %v1597_v31, %v244_v40  ;;  %v278_v44 = vmul.f32 %v1606_v39, %v244_v40  ;;  %v192_v45 = vpop.f32.mrb[7].mxu0 }
 0x102   :  { %v279_v48 = vadd.f32 %v278_v44, %v260_v46  ;;  %v266_v49 = vadd.f32 %v1603_v36, %v255_v43 }
 0x104   :  { %v336_v50 = vadd.f32 %v330_v18, %v279_v48  ;;  %v1615_v51 = vadd.f32 %v272_v47, %v266_v49  ;;  %v39_v49 = vld [vmem:[%s1818_s2 + $0x20] sm:$0xff] }
 0x106   :  { %1394 = vtanh.f32 %v336_v50  ;;  %v337_v53 = vmul.f32 0.5, %v336_v50 }
 0x108   :  { %1396 = vtanh.f32 %v337_v53 }
 0x110   :  { %v1395_v52 = vpop.eup %1394 }
 0x111   :  { %344 = vrot.lane.b32.xlu1 %v1395_v52, %s1463_s3 }
 0x112   :  { %v1397_v54 = vpop.eup %1396 }
 0x113   :  { %v339_v55 = vmul.f32 0.5, %v1397_v54 }
 0x115   :  { %v340_v56 = vadd.f32 0.5, %v339_v55 }
 0x117   :  { %v342_v59 = vmul.f32 0.0, %v340_v56 }
 0x183   :  { %v345_v57 = vpop.permute.xlu1 %344 }
 0x184   :  { %v347_v58 = vmul.f32 %v345_v57, %v340_v56 }
 0x186   :  { %349 = vrot.lane.b32.xlu1 %v347_v58, %s1464_s20 }
 0x1f8   :  { %v350_v60 = vpop.permute.xlu1 %349 }
 0x1f9   :  { %v352_v61 = vadd.f32 %v350_v60, %v342_v59 }
 0x1fb   :  { %1398 = vtanh.f32 %v352_v61 }
 0x205   :  { %v1399_v62 = vpop.eup %1398 }
 0x206   :  { %355 = vrot.lane.b32.xlu0 %v1399_v62, %s1463_s3 }
 0x20a   :  { %210 = vperm.xlu0 %1362, %v36_v63  }
 0x278   :  { %v356_v0 = vpop.permute.xlu0 %355 }
 0x279   :  { %v358_v1 = vmul.f32 %v356_v0, %v340_v56 }
 0x27b   :  { %v360_v3 = vpack.c.bf16 %v358_v1, %v358_v1 }
 0x27d   :  { %362 = vrot.lane.b32.xlu1 %v360_v3, %s1464_s20 }
 0x281   :  { %230 = vperm.xlu1 %1363, %v40_v4  }
 0x289   :  { %v211_v6 = vpop.permute.xlu0 %210 }
 0x28a   :  { %v239_v8 = vmul.f32 %v211_v6, %v176_v32 }
 0x28c   :  { %v250_v10 = vmul.f32 %v1597_v31, %v239_v8  ;;  %v273_v16 = vmul.f32 %v1606_v39, %v239_v8 }
 0x28e   :  { %v261_v15 = vadd.f32 %v1603_v36, %v250_v10 }
 0x2ef   :  { %v363_v5 = vpop.permute.xlu1 %362 }
 0x2f0   :  { %1260 = vmatmul.mubr.msk.bf16.vlgmr.msra.gmra.mrb[4].mxu1 %vm292_vm1, %v363_v5 }
 0x2f1   :  { %1264 = vmatpush3.bf16.msra.mxu1 %v1537_v7  ;;  %1267 = vmatprep.mubr.msk.bf16.mxu1 %vm1461_vm0, %v1460_v2 }
 0x2f2   :  { %1265 = vmatprep.subr.bf16.mxu1 %v1460_v2 }
 0x2f5   :  { %1266 = vmatpush3.bf16.msra.mxu1 %v1547_v9 }
 0x2f6   :  { %1271 = vmatprep.subr.bf16.mxu1 %v1460_v2 }
 0x300   :  { %v231_v11 = vpop.permute.xlu1 %230 }
 0x301   :  { %v243_v12 = vmul.f32 %v231_v11, %v192_v45  ;;  %v37_v45 = vld [vmem:[%s1818_s2 + $0x10] sm:$0xff] }
 0x303   :  { %v254_v13 = vmul.f32 %v1597_v31, %v243_v12  ;;  %v277_v14 = vmul.f32 %v1606_v39, %v243_v12 }
 0x305   :  { %v359_v17 = vadd.f32 %v277_v14, %v261_v15  ;;  %v265_v18 = vadd.f32 %v1603_v36, %v254_v13 }
 0x307   :  { %v1640_v19 = vadd.f32 %v273_v16, %v265_v18 }
 0x3c3   :  { %v401_v20 = vpop.f32.mrb[4].mxu1 }
 0x3c4   :  { %v407_v21 = vadd.f32 %v401_v20, %v359_v17  ;;  %v1261_v22 = vpop.f32.mrb[5].mxu1  ;;  %v38_v17 = vld [vmem:[%s1818_s2 + $0x18] sm:$0xff] }
 0x3c5   :  { %v404_v26 = vpop.f32.mrb[6].mxu1 }
 0x3c6   :  { %1400 = vtanh.f32 %v407_v21  ;;  %v1262_v27 = vpop.f32.mrb[7].mxu1  ;;  %v408_v30 = vmul.f32 0.5, %v407_v21 }
 0x3c8   :  { %1402 = vtanh.f32 %v408_v30 }
 0x3d0   :  { %v1401_v28 = vpop.eup %1400 }
 0x3d1   :  { %415 = vrot.lane.b32.xlu0 %v1401_v28, %s1463_s3 }
 0x3d2   :  { %v1403_v32 = vpop.eup %1402 }
 0x3d3   :  { %v410_v34 = vmul.f32 0.5, %v1403_v32 }
 0x3d5   :  { %v411_v35 = vadd.f32 0.5, %v410_v34 }
 0x3d7   :  { %v413_v40 = vmul.f32 %v411_v35, %v352_v61 }
 0x443   :  { %v416_v37 = vpop.permute.xlu0 %415 }
 0x444   :  { %v418_v38 = vmul.f32 %v416_v37, %v411_v35 }
 0x446   :  { %420 = vrot.lane.b32.xlu1 %v418_v38, %s1464_s20 }
 0x4b8   :  { %v421_v42 = vpop.permute.xlu1 %420 }
 0x4b9   :  { %v423_v43 = vadd.f32 %v421_v42, %v413_v40 }
 0x4bb   :  { %1404 = vtanh.f32 %v423_v43 }
 0x4c5   :  { %v1405_v44 = vpop.eup %1404 }
 0x4c6   :  { %426 = vrot.lane.b32.xlu0 %v1405_v44, %s1463_s3 }
 0x4ca   :  { %215 = vperm.xlu0 %1362, %v37_v45  }
 0x538   :  { %v427_v46 = vpop.permute.xlu0 %426 }
 0x539   :  { %v429_v47 = vmul.f32 %v427_v46, %v411_v35 }
 0x53b   :  { %v431_v48 = vpack.c.bf16 %v429_v47, %v429_v47 }
 0x53d   :  { %433 = vrot.lane.b32.xlu1 %v431_v48, %s1464_s20 }
 0x541   :  { %225 = vperm.xlu1 %1363, %v39_v49  }
 0x549   :  { %v216_v52 = vpop.permute.xlu0 %215 }
 0x54a   :  { %v240_v53 = vmul.f32 %v1589_v25, %v216_v52 }
 0x54c   :  { %v251_v54 = vmul.f32 %v1597_v31, %v240_v53  ;;  %v274_v60 = vmul.f32 %v1606_v39, %v240_v53 }
 0x54e   :  { %v262_v59 = vadd.f32 %v1603_v36, %v251_v54 }
 0x5af   :  { %v434_v50 = vpop.permute.xlu1 %433 }
 0x5b0   :  { %1268 = vmatmul.mubr.msk.bf16.vlgmr.msra.gmra.mrb[8].mxu1 %vm292_vm1, %v434_v50 }
 0x5b1   :  { %1272 = vmatpush3.bf16.msra.mxu1 %v1537_v7  ;;  %1275 = vmatprep.mubr.msk.bf16.mxu1 %vm1461_vm0, %v1460_v2 }
 0x5b2   :  { %1273 = vmatprep.subr.bf16.mxu1 %v1460_v2 }
 0x5b5   :  { %1274 = vmatpush3.bf16.msra.mxu1 %v1547_v9 }
 0x5b6   :  { %1279 = vmatprep.subr.bf16.mxu1 %v1460_v2 }
 0x5c0   :  { %v226_v55 = vpop.permute.xlu1 %225 }
 0x5c1   :  { %v242_v56 = vmul.f32 %v226_v55, %v1608_v41 }
 0x5c3   :  { %v253_v57 = vmul.f32 %v1597_v31, %v242_v56  ;;  %v276_v58 = vmul.f32 %v1606_v39, %v242_v56 }
 0x5c5   :  { %v430_v61 = vadd.f32 %v276_v58, %v262_v59  ;;  %v264_v62 = vadd.f32 %v1603_v36, %v253_v57 }
 0x5c7   :  { %v1667_v63 = vadd.f32 %v274_v60, %v264_v62 }
 0x683   :  { %v472_v0 = vpop.f32.mrb[8].mxu1 }
 0x684   :  { %v478_v25 = vadd.f32 %v472_v0, %v430_v61  ;;  %v1269_v1 = vpop.f32.mrb[9].mxu1 }
 0x685   :  { %v475_v3 = vpop.f32.mrb[10].mxu1 }
 0x686   :  { %1406 = vtanh.f32 %v478_v25  ;;  %v1270_v4 = vpop.f32.mrb[11].mxu1  ;;  %v479_v5 = vmul.f32 0.5, %v478_v25 }
 0x688   :  { %1408 = vtanh.f32 %v479_v5 }
 0x690   :  { %v1407_v41 = vpop.eup %1406 }
 0x691   :  { %486 = vrot.lane.b32.xlu0 %v1407_v41, %s1463_s3 }
 0x692   :  { %v1409_v6 = vpop.eup %1408 }
 0x693   :  { %v481_v8 = vmul.f32 0.5, %v1409_v6 }
 0x695   :  { %v482_v10 = vadd.f32 0.5, %v481_v8 }
 0x697   :  { %v484_v13 = vmul.f32 %v482_v10, %v423_v43 }
 0x703   :  { %v487_v11 = vpop.permute.xlu0 %486 }
 0x704   :  { %v489_v12 = vmul.f32 %v487_v11, %v482_v10 }
 0x706   :  { %491 = vrot.lane.b32.xlu1 %v489_v12, %s1464_s20 }
 0x778   :  { %v492_v14 = vpop.permute.xlu1 %491 }
 0x779   :  { %v494_v15 = vadd.f32 %v492_v14, %v484_v13 }
 0x77b   :  { %1410 = vtanh.f32 %v494_v15 }
 0x785   :  { %v1411_v16 = vpop.eup %1410 }
 0x786   :  { %497 = vrot.lane.b32.xlu0 %v1411_v16, %s1463_s3 }
 0x78a   :  { %220 = vperm.xlu0 %1362, %v38_v17  }
 0x7f8   :  { %v498_v18 = vpop.permute.xlu0 %497 }
 0x7f9   :  { %v500_v20 = vmul.f32 %v498_v18, %v482_v10 }
 0x7fb   :  { %v502_v21 = vpack.c.bf16 %v500_v20, %v500_v20 }
 0x7fd   :  { %504 = vrot.lane.b32.xlu1 %v502_v21, %s1464_s20 }
 0x809   :  { %v221_v26 = vpop.permute.xlu0 %220 }
 0x80a   :  { %v241_v27 = vmul.f32 %v1594_v29, %v221_v26 }
 0x80c   :  { %v252_v28 = vmul.f32 %v1597_v31, %v241_v27  ;;  %v275_v32 = vmul.f32 %v1606_v39, %v241_v27 }
 0x80e   :  { %v263_v30 = vadd.f32 %v1603_v36, %v252_v28 }
 0x810   :  { %v501_v34 = vadd.f32 %v275_v32, %v263_v30 }
 0x86f   :  { %v505_v22 = vpop.permute.xlu1 %504 }
 0x870   :  { %1276 = vmatmul.mubr.msk.bf16.vlgmr.msra.gmra.mrb[12].mxu1 %vm292_vm1, %v505_v22 }
 0x871   :  { %1280 = vmatpush3.bf16.msra.mxu1 %v1537_v7  ;;  %1283 = vmatprep.mubr.msk.bf16.mxu1 %vm1461_vm0, %v1460_v2 }
 0x872   :  { %1281 = vmatprep.subr.bf16.mxu1 %v1460_v2 }
 0x875   :  { %1282 = vmatpush3.bf16.msra.mxu1 %v1547_v9 }
 0x876   :  { %1287 = vmatprep.subr.bf16.mxu1 %v1460_v2 }
 0x943   :  { %v543_v35 = vpop.f32.mrb[12].mxu1 }
 0x944   :  { %v549_v37 = vadd.f32 %v543_v35, %v501_v34  ;;  %v1277_v38 = vpop.f32.mrb[13].mxu1 }
 0x945   :  { %v546_v40 = vpop.f32.mrb[14].mxu1 }
 0x946   :  { %1412 = vtanh.f32 %v549_v37  ;;  %v1278_v42 = vpop.f32.mrb[15].mxu1  ;;  %v550_v44 = vmul.f32 0.5, %v549_v37 }
 0x948   :  { %1414 = vtanh.f32 %v550_v44 }
 0x950   :  { %v1413_v43 = vpop.eup %1412 }
 0x951   :  { %557 = vrot.lane.b32.xlu1 %v1413_v43, %s1463_s3 }
 0x952   :  { %v1415_v45 = vpop.eup %1414 }
 0x953   :  { %v552_v29 = vmul.f32 0.5, %v1415_v45 }
 0x955   :  { %v553_v46 = vadd.f32 0.5, %v552_v29 }
 0x957   :  { %v555_v36 = vmul.f32 %v553_v46, %v494_v15 }
 0x9c3   :  { %v558_v31 = vpop.permute.xlu1 %557 }
 0x9c4   :  { %v560_v47 = vmul.f32 %v558_v31, %v553_v46 }
 0x9c6   :  { %562 = vrot.lane.b32.xlu0 %v560_v47, %s1464_s20 }
 0xa38   :  { %v563_v39 = vpop.permute.xlu0 %562 }
 0xa39   :  { %v565_v48 = vadd.f32 %v563_v39, %v555_v36 }
 0xa3b   :  { %1416 = vtanh.f32 %v565_v48 }
 0xa45   :  { %v1417_v49 = vpop.eup %1416 }
 0xa46   :  { %568 = vrot.lane.b32.xlu1 %v1417_v49, %s1463_s3 }
 0xab8   :  { %v569_v50 = vpop.permute.xlu1 %568 }
 0xab9   :  { %v571_v52 = vmul.f32 %v569_v50, %v553_v46  ;;  %v1379_v50 = vld [vmem:[%s1821_s5 + $0x8] sm:$0xff]  }
 0xabb   :  { %v573_v53 = vpack.c.bf16 %v571_v52, %v571_v52  ;;  %v1387_v52 = vld [vmem:[%s1821_s5 + $0x40] sm:$0xff]  }
 0xabd   :  { %575 = vrot.lane.b32.xlu0 %v573_v53, %s1464_s20  ;;  %v1389_v53 = vld [vmem:[%s1821_s5 + $0x48] sm:$0xff]  }
 0xb2f   :  { %v576_v54 = vpop.permute.xlu0 %575 }
 0xb30   :  { %1284 = vmatmul.mubr.msk.bf16.vlgmr.msra.gmra.mrb[16].mxu1 %vm292_vm1, %v576_v54 }
 0xb31   :  { %1288 = vmatpush3.bf16.msra.mxu1 %v1537_v7  ;;  %1291 = vmatprep.mubr.msk.bf16.mxu1 %vm1461_vm0, %v1460_v2 }
 0xb32   :  { %1289 = vmatprep.subr.bf16.mxu1 %v1460_v2 }
 0xb35   :  { %1290 = vmatpush3.bf16.msra.mxu1 %v1547_v9 }
 0xb36   :  { %1295 = vmatprep.subr.bf16.mxu1 %v1460_v2 }
 0xc03   :  { %v614_v55 = vpop.f32.mrb[16].mxu1 }
 0xc04   :  { %v620_v56 = vadd.f32 %v614_v55, %v1667_v63  ;;  %v1285_v57 = vpop.f32.mrb[17].mxu1  ;;  %v1380_v55 = vld [vmem:[%s1821_s5 + $0x10] sm:$0xff]  }
 0xc05   :  { %v617_v58 = vpop.f32.mrb[18].mxu1  ;;  %v1382_v57 = vld [vmem:[%s1821_s5 + $0x20] sm:$0xff]  }
 0xc06   :  { %1418 = vtanh.f32 %v620_v56  ;;  %v1286_v59 = vpop.f32.mrb[19].mxu1  ;;  %v621_v61 = vmul.f32 0.5, %v620_v56  ;;  %v1381_v56 = vld [vmem:[%s1821_s5 + $0x18] sm:$0xff]   ;;  %v1383_v58 = vld [vmem:[%s1821_s5 + $0x28] sm:$0xff]  }
 0xc07   :  { %v1384_v59 = vld [vmem:[%s1821_s5 + $0x30] sm:$0xff]  }
 0xc08   :  { %1420 = vtanh.f32 %v621_v61  ;;  %v786_v61 = vld [vmem:[%s1817_s1] sm:$0x1] }
 0xc10   :  { %v1419_v60 = vpop.eup %1418 }
 0xc11   :  { %628 = vrot.lane.b32.xlu1 %v1419_v60, %s1463_s3  ;;  %v1385_v60 = vld [vmem:[%s1821_s5 + $0x38] sm:$0xff]  }
 0xc12   :  { %v1421_v62 = vpop.eup %1420 }
 0xc13   :  { %v623_v0 = vmul.f32 0.5, %v1421_v62  ;;  %v1386_v62 = vld [vmem:[%s1821_s5 + $0x50] sm:$0xff]  }
 0xc15   :  { %v624_v25 = vadd.f32 0.5, %v623_v0  ;;  %v1388_v0 = vld [vmem:[%s1821_s5 + $0x58] sm:$0xff]  }
 0xc17   :  { %v626_v4 = vmul.f32 %v624_v25, %v565_v48 }
 0xc83   :  { %v629_v1 = vpop.permute.xlu1 %628 }
 0xc84   :  { %v631_v3 = vmul.f32 %v629_v1, %v624_v25 }
 0xc86   :  { %633 = vrot.lane.b32.xlu0 %v631_v3, %s1464_s20 }
 0xcf8   :  { %v634_v41 = vpop.permute.xlu0 %633 }
 0xcf9   :  { %v636_v5 = vadd.f32 %v634_v41, %v626_v4  ;;  %v1390_v41 = vld [vmem:[%s1823_s7] sm:$0xff]  }
 0xcfb   :  { %1422 = vtanh.f32 %v636_v5 }
 0xd05   :  { %v1423_v63 = vpop.eup %1422 }
 0xd06   :  { %639 = vrot.lane.b32.xlu1 %v1423_v63, %s1463_s3 }
 0xd78   :  { %v640_v6 = vpop.permute.xlu1 %639 }
 0xd79   :  { %v642_v8 = vmul.f32 %v640_v6, %v624_v25  ;;  %v1391_v6 = vld [vmem:[%s1823_s7 + $0x8] sm:$0xff]  }
 0xd7b   :  { %v644_v10 = vpack.c.bf16 %v642_v8, %v642_v8  ;;  %v1392_v8 = vld [vmem:[%s1823_s7 + $0x10] sm:$0xff]  }
 0xd7d   :  { %646 = vrot.lane.b32.xlu0 %v644_v10, %s1464_s20  ;;  %v1393_v10 = vld [vmem:[%s1823_s7 + $0x18] sm:$0xff]  }
 0xdef   :  { %v647_v11 = vpop.permute.xlu0 %646 }
 0xdf0   :  { %1292 = vmatmul.mubr.msk.bf16.vlgmr.msra.gmra.mrb[20].mxu1 %vm292_vm1, %v647_v11  ;;  %v811_v11 = vld [vmem:[%s1822_s6] sm:$0x3] }
 0xdf1   :  { %1296 = vmatpush3.bf16.msra.mxu1 %v1537_v7  ;;  %1299 = vmatprep.mubr.msk.bf16.mxu1 %vm1461_vm0, %v1460_v2 }
 0xdf2   :  { %1297 = vmatprep.subr.bf16.mxu1 %v1460_v2 }
 0xdf5   :  { %1298 = vmatpush3.bf16.msra.mxu1 %v1547_v9 }
 0xdf6   :  { %1303 = vmatprep.subr.bf16.mxu1 %v1460_v2 }
 0xec3   :  { %v685_v12 = vpop.f32.mrb[20].mxu1 }
 0xec4   :  { %v691_v13 = vadd.f32 %v685_v12, %v1640_v19  ;;  %v1293_v14 = vpop.f32.mrb[21].mxu1 }
 0xec5   :  { %v688_v15 = vpop.f32.mrb[22].mxu1  ;;  %v1020_v14 = vrot.slane %v811_v11, %v258_v33 }
 0xec6   :  { %1424 = vtanh.f32 %v691_v13  ;;  %v1294_v16 = vpop.f32.mrb[23].mxu1  ;;  %v692_v7 = vmul.f32 0.5, %v691_v13 }
 0xec8   :  { %1426 = vtanh.f32 %v692_v7  ;;  %v1025_v7 = vrot.slane %v811_v11, %v1587_v24 }
 0xed0   :  { %v1425_v17 = vpop.eup %1424 }
 0xed1   :  { %699 = vrot.lane.b32.xlu1 %v1425_v17, %s1463_s3 }
 0xed2   :  { %v1427_v18 = vpop.eup %1426 }
 0xed3   :  { %v694_v20 = vmul.f32 0.5, %v1427_v18 }
 0xed5   :  { %v695_v21 = vadd.f32 0.5, %v694_v20 }
 0xed7   :  { %v697_v9 = vmul.f32 %v695_v21, %v636_v5 }
 0xf43   :  { %v700_v22 = vpop.permute.xlu1 %699 }
 0xf44   :  { %v702_v26 = vmul.f32 %v700_v22, %v695_v21 }
 0xf46   :  { %704 = vrot.lane.b32.xlu0 %v702_v26, %s1464_s20 }
 0xfb8   :  { %v705_v27 = vpop.permute.xlu0 %704 }
 0xfb9   :  { %v707_v28 = vadd.f32 %v705_v27, %v697_v9 }
 0xfbb   :  { %1428 = vtanh.f32 %v707_v28 }
 0xfc5   :  { %v1429_v19 = vpop.eup %1428 }
 0xfc6   :  { %710 = vrot.lane.b32.xlu1 %v1429_v19, %s1463_s3 }
0x1038   :  { %v711_v30 = vpop.permute.xlu1 %710 }
0x1039   :  { %v713_v32 = vmul.f32 %v711_v30, %v695_v21 }
0x103b   :  { %v715_v34 = vpack.c.bf16 %v713_v32, %v713_v32 }
0x103d   :  { %717 = vrot.lane.b32.xlu0 %v715_v34, %s1464_s20 }
0x10af   :  { %v718_v35 = vpop.permute.xlu0 %717 }
0x10b0   :  { %1300 = vmatmul.mubr.msk.bf16.vlgmr.msra.gmra.mrb[24].mxu1 %vm292_vm1, %v718_v35 }
0x10b1   :  { %1307 = vmatprep.mubr.msk.bf16.mxu1 %vm1461_vm0, %v1460_v2  ;;  %1304 = vmatpush3.bf16.msra.mxu1 %v1387_v52 }
0x10b2   :  { %1305 = vmatprep.subr.bf16.mxu1 %v1460_v2 }
0x10b5   :  { %1306 = vmatpush3.bf16.msra.mxu1 %v1389_v53 }
0x10b6   :  { %1339 = vmatprep.subr.bf16.mxu1 %v1460_v2 }
0x1183   :  { %v756_v37 = vpop.f32.mrb[24].mxu1 }
0x1184   :  { %v762_v38 = vadd.f32 %v756_v37, %v1615_v51  ;;  %v1301_v40 = vpop.f32.mrb[25].mxu1  ;;  %v1378_v51 = vld [vmem:[%s1821_s5] sm:$0xff]  }
0x1185   :  { %v759_v42 = vpop.f32.mrb[26].mxu1  ;;  %1312 = vmatpush3.bf16.msra.mxu0 %v1378_v51 }
0x1186   :  { %1430 = vtanh.f32 %v762_v38  ;;  %v1302_v43 = vpop.f32.mrb[27].mxu1  ;;  %v763_v45 = vmul.f32 0.5, %v762_v38  ;;  %1313 = vmatprep.subr.bf16.mxu0 %v1460_v2 }
0x1188   :  { %1432 = vtanh.f32 %v763_v45 }
0x1189   :  { %1314 = vmatpush3.bf16.msra.mxu0 %v1379_v50 }
0x118a   :  { %1315 = vmatprep.subr.bf16.mxu0 %v1460_v2 }
0x118d   :  { %1316 = vmatpush3.bf16.msra.mxu0 %v1380_v55 }
0x118e   :  { %1317 = vmatprep.subr.bf16.mxu0 %v1460_v2 }
0x1190   :  { %v1431_v44 = vpop.eup %1430 }
0x1191   :  { %770 = vrot.lane.b32.xlu1 %v1431_v44, %s1463_s3  ;;  %1318 = vmatpush3.bf16.msra.mxu0 %v1381_v56 }
0x1192   :  { %v1433_v29 = vpop.eup %1432  ;;  %1319 = vmatprep.subr.bf16.mxu0 %v1460_v2 }
0x1193   :  { %v765_v46 = vmul.f32 0.5, %v1433_v29 }
0x1195   :  { %v766_v31 = vadd.f32 0.5, %v765_v46  ;;  %1320 = vmatpush3.bf16.msra.mxu0 %v1382_v57 }
0x1196   :  { %1321 = vmatprep.subr.bf16.mxu0 %v1460_v2 }
0x1197   :  { %v768_v39 = vmul.f32 %v766_v31, %v707_v28 }
0x1199   :  { %1322 = vmatpush3.bf16.msra.mxu0 %v1383_v58 }
0x119a   :  { %1323 = vmatprep.subr.bf16.mxu0 %v1460_v2 }
0x119d   :  { %1324 = vmatpush3.bf16.msra.mxu0 %v1384_v59 }
0x119e   :  { %1325 = vmatprep.subr.bf16.mxu0 %v1460_v2 }
0x11a1   :  { %1326 = vmatpush3.bf16.msra.mxu0 %v1385_v60 }
0x11a2   :  { %1331 = vmatprep.subr.bf16.mxu0 %v1460_v2 }
0x11a4   :  { %1328 = vmatmul.mubr.bf16.vlgmr.msra.gmra.mrb[8].mxu0 %v786_v61 }
0x11a5   :  { %1332 = vmatpush3.bf16.msra.mxu0 %v1386_v62  ;;  %1335 = vmatprep.mubr.msk.bf16.mxu0 %vm1461_vm0, %v1460_v2 }
0x11a6   :  { %1333 = vmatprep.subr.bf16.mxu0 %v1460_v2 }
0x11a9   :  { %1334 = vmatpush3.bf16.msra.mxu0 %v1388_v0 }
0x1203   :  { %v771_v47 = vpop.permute.xlu1 %770 }
0x1204   :  { %v773_v36 = vmul.f32 %v771_v47, %v766_v31 }
0x1206   :  { %775 = vrot.lane.b32.xlu0 %v773_v36, %s1464_s20 }
0x1278   :  { %v776_v48 = vpop.permute.xlu0 %775 }
0x1279   :  { %v778_v49 = vadd.f32 %v776_v48, %v768_v39 }
0x127b   :  { %1434 = vtanh.f32 %v778_v49 }
0x1285   :  { %v1435_v54 = vpop.eup %1434 }
0x1286   :  { %781 = vrot.lane.b32.xlu1 %v1435_v54, %s1463_s3 }
0x12f8   :  { %v782_v25 = vpop.permute.xlu1 %781 }
0x12f9   :  { %v784_v1 = vmul.f32 %v782_v25, %v766_v31 }
0x12fb   :  { %v785_v3 = vpack.c.bf16 %v784_v1, %v784_v1 }
0x12fd   :  { %v958_v4 = vrot.slane %v785_v3, 1  ;;  %813 = vrot.lane.b32.xlu0 %v785_v3, %s1464_s20 }
0x12ff   :  { %959 = vrot.lane.b32.xlu1 %v958_v4, %s1464_s20 }
0x136f   :  { %v814_v5 = vpop.permute.xlu0 %813 }
0x1370   :  { %1308 = vmatmul.mubr.msk.bf16.vlgmr.msra.gmra.mrb[28].mxu1 %vm292_vm1, %v814_v5 }
0x1371   :  { %v960_v63 = vpop.permute.xlu1 %959  ;;  %1340 = vmatpush3.bf16.msra.mxu1 %v1390_v41  ;;  %1347 = vmatprep.mubr.msk.bf16.mxu1 %vm1461_vm0, %v1460_v2 }
0x1372   :  { %1336 = vmatmul.mubr.msk.bf16.vlgmr.msra.gmra.mrb[8].mxu0 %vm292_vm1, %v960_v63  ;;  %1341 = vmatprep.subr.bf16.mxu1 %v1460_v2 }
0x1375   :  { %1342 = vmatpush3.bf16.msra.mxu1 %v1391_v6 }
0x1376   :  { %1343 = vmatprep.subr.bf16.mxu1 %v1460_v2 }
0x1379   :  { %1344 = vmatpush3.bf16.msra.mxu1 %v1392_v8 }
0x137a   :  { %1345 = vmatprep.subr.bf16.mxu1 %v1460_v2 }
0x137d   :  { %1346 = vmatpush3.bf16.msra.mxu1 %v1393_v10 }
0x1443   :  { %v864_v12 = vpop.f32.mrb[28].mxu1 }
0x1444   :  { %v1309_v13 = vpop.f32.mrb[29].mxu1 }
0x1445   :  { %v867_v15 = vpop.f32.mrb[30].mxu1  ;;  %v1010_v16 = vpop.f32.mrb[8].mxu0 }
0x1446   :  { %v1351_v17 = vadd.f32 %v1010_v16, %v864_v12  ;;  %v1310_v2 = vpop.f32.mrb[31].mxu1  ;;  %v1337_v18 = vpop.f32.mrb[9].mxu0 }
0x1447   :  { %v1013_v20 = vpop.f32.mrb[10].mxu0 }
0x1448   :  { %v1021_v21 = vmul.f32 %v1351_v17, %v1020_v14  ;;  %v1338_v22 = vpop.f32.mrb[11].mxu0 }
0x144a   :  { %v1026_v26 = vadd.f32 %v1025_v7, %v1021_v21 }
0x144c   :  { %vm1027_vm2 = vcmp.gt.f32.partialorder %v1026_v26, 0.0  ;;  %v1028_v9 = vmul.f32 0.01, %v1026_v26 }
0x144e   :  { %v1029_v27 = vsel %vm1027_vm2, %v1026_v26, %v1028_v9 }
0x144f   :  { %v1030_v28 = vpack.c.bf16 %v1029_v27, %v1029_v27 }
0x1451   :  { %1348 = vmatmul.mubr.msk.bf16.vlgmr.msra.gmra.mrb[32].mxu1 %vm1070_vm3, %v1030_v28 }
0x1524   :  { %v1108_v33 = vpop.f32.mrb[32].mxu1 }
0x1525   :  { %v1109_v24 = vadd.f32 %v1164_v23, %v1108_v33  ;;  %v1349_v19 = vpop.f32.mrb[33].mxu1 }
0x1526   :  { %v1111_v30 = vpop.f32.mrb[34].mxu1 }
0x1527   :  { %v1350_v32 = vpop.f32.mrb[35].mxu1  ;;  %1115 = vst.msk [vmem:[#allocation2] sm:$0x3] %vm1114_vm4, %v1109_v24 }
0x1528   :  { %1447 = shalt.err (!%p1444_p4)
}
0x1529   :  { %s1448_s8 = scalar_lea.hbm %s1825_s9, 32 }
0x152a   :  { %p1449_p5 = scmp.ne.s32.totalorder %s1825_s9, %s1448_s8  ;;  %p1452_p6 = scmp.lt.u32.totalorder %s1448_s8, %s1825_s9 }
0x152c   :  { %p1454_p7 = pnand %p1452_p6, %p1449_p5 }
0x152e   :  { %1457 = shalt.err (!%p1454_p7)
}
0x152f   :  { %1125 = dma.vmem_to_hbm [thread:$0]  %s1123_s18, 32, %s1825_s9, [#allocation3]  }
0x1530   :  { %1458 = dma.done.wait [#allocation3], 32  }
0x1531   :  { %1459 = vsyncadd [#allocation3], 4294967264 }
0x1532   :  { %1129 = vsyncpa [#allocation3], 1 }

</bundles_post_ra>
